<compile_context>
chip_gen: v5e
topology: v5e:2x2
jax: 0.10.0
libtpu: 0.0.40
codegen_flags: <defaults>
</compile_context>

<pallas_src>
import jax
import jax.numpy as jnp
from jax import lax
from jax.experimental import pallas as pl
from jax.experimental.pallas import tpu as pltpu


_SUB = 256  # width of the fixed triangular MXU tile (use 128 on v5e)


def _lovasz_kernel(gts_ref, e_ref, g_ref, out_ref,
                   tri_ref, pos_ref, cum_ref, carry_ref, prev_ref, acc_ref):
    """One grid step = one (block_c, block_p) block of sorted errors/targets.

    gts_ref  : (Cb, 1)   per-class foreground count (resident per class block)
    e_ref    : (Cb, Pb)  errors sorted descending (this block), f32
    g_ref    : (Cb, Pb)  0/1 targets reordered by the same sort, bf16
    out_ref  : (Cb, 128) per-class losses broadcast along lanes (written once)
    tri_ref  : (SUB,SUB) bf16 upper-triangular ones (fixed size, built once)
    pos_ref  : (1, Pb)   local 1-based positions (built once)
    cum_ref  : (Cb, Pb)  scratch holding the assembled block cumsum
    carry_ref: (Cb, 1)   running cumsum(g) carry across P blocks
    prev_ref : (Cb, 1)   previous block's last jaccard value
    acc_ref  : (Cb, 1)   running per-class loss accumulator
    """
    pi = pl.program_id(1)
    Cb, Pb = e_ref.shape
    SUB = tri_ref.shape[0]
    nb = Pb // SUB

    @pl.when(pi == 0)
    def _init():
        r = lax.broadcasted_iota(jnp.int32, (SUB, SUB), 0)
        c = lax.broadcasted_iota(jnp.int32, (SUB, SUB), 1)
        tri_ref[...] = (r <= c).astype(jnp.bfloat16)
        pos_ref[...] = (lax.broadcasted_iota(jnp.int32, (1, Pb), 1)
                        + 1).astype(jnp.float32)
        carry_ref[...] = jnp.zeros_like(carry_ref)
        prev_ref[...] = jnp.zeros_like(prev_ref)
        acc_ref[...] = jnp.zeros_like(acc_ref)

    tri = tri_ref[...]

    # ---- blocked inclusive cumsum of g over the block (fixed SUB-wide MXU
    # tiles, running per-class carry; bf16 {0,1} operands => exact in f32 acc).
    run = carry_ref[...]                          # (Cb, 1)
    for j in range(nb):                           # static unroll, nb = Pb // SUB
        gj = g_ref[:, j * SUB:(j + 1) * SUB]      # (Cb, SUB) bf16
        cj = jnp.dot(gj, tri, preferred_element_type=jnp.float32) + run
        cum_ref[:, j * SUB:(j + 1) * SUB] = cj
        run = cj[:, SUB - 1:SUB]
    carry_ref[...] = run

    # ---- jaccard / lovasz grad / loss on the whole block at once ----------
    e = e_ref[...]                                # (Cb, Pb) f32
    gts = gts_ref[...]                            # (Cb, 1)  f32
    cum_g = cum_ref[...]                          # (Cb, Pb) f32
    pos_local = pos_ref[...]                      # (1, Pb)  1..Pb
    pos = pos_local + (pi * Pb).astype(jnp.float32)   # global 1-based position
    intersection = gts - cum_g                    # gts - cumsum(g)
    union = gts + (pos - cum_g)                   # gts + cumsum(1-g) >= 1
    jaccard = 1.0 - intersection / union

    # lovasz grad: jaccard[j] - jaccard[j-1]; block column 0 uses the carry
    # (carry is 0 on the first block, so grad[0] == jaccard[0]).
    rolled = pltpu.roll(jaccard, shift=1, axis=1)
    prev_b = jnp.broadcast_to(prev_ref[...], jaccard.shape)
    is_first = jnp.broadcast_to(pos_local == 1.0, jaccard.shape)
    grad = jaccard - jnp.where(is_first, prev_b, rolled)

    acc_ref[...] += jnp.sum(e * grad, axis=1, keepdims=True)
    prev_ref[...] = jaccard[:, Pb - 1:Pb]

    @pl.when(pi == pl.num_programs(1) - 1)
    def _finalize():
        out_ref[...] = jnp.broadcast_to(acc_ref[...], out_ref.shape)


def _lovasz_losses_pallas(e_sorted, g_sorted, gts, *,
                          block_p=4096, block_c=8, sub=_SUB):
    """e_sorted (C,P) f32, g_sorted (C,P) bf16 — sorted descending by error
    along axis 1.  gts (C,1) f32 per-class counts.  Returns (C,) losses."""
    C, P = e_sorted.shape
    # Shrink the P block for small problems; keep it a multiple of the MXU tile.
    block_p = max(sub, min(block_p, pl.cdiv(P, sub) * sub))
    assert block_p % sub == 0 and block_c % 8 == 0

    # Pad classes / positions.  Padded entries have e == 0 and g == 0, so they
    # contribute exactly zero to every per-class loss.
    Cp = pl.cdiv(C, block_c) * block_c
    Pp = pl.cdiv(P, block_p) * block_p
    e_sorted = jnp.pad(e_sorted, ((0, Cp - C), (0, Pp - P)))
    g_sorted = jnp.pad(g_sorted, ((0, Cp - C), (0, Pp - P)))
    gts = jnp.pad(gts, ((0, Cp - C), (0, 0)))

    grid = (Cp // block_c, Pp // block_p)
    out = pl.pallas_call(
        _lovasz_kernel,
        out_shape=jax.ShapeDtypeStruct((Cp, 128), jnp.float32),
        grid_spec=pltpu.PrefetchScalarGridSpec(
            num_scalar_prefetch=0,
            grid=grid,
            in_specs=[
                pl.BlockSpec((block_c, 1), lambda ci, pi: (ci, 0)),         # gts
                pl.BlockSpec((block_c, block_p), lambda ci, pi: (ci, pi)),  # errors
                pl.BlockSpec((block_c, block_p), lambda ci, pi: (ci, pi)),  # targets
            ],
            out_specs=pl.BlockSpec((block_c, 128), lambda ci, pi: (ci, 0)),
            scratch_shapes=[
                pltpu.VMEM((sub, sub), jnp.bfloat16),         # fixed tri tile
                pltpu.VMEM((1, block_p), jnp.float32),        # local positions
                pltpu.VMEM((block_c, block_p), jnp.float32),  # block cumsum
                pltpu.VMEM((block_c, 1), jnp.float32),        # cumsum carry
                pltpu.VMEM((block_c, 1), jnp.float32),        # prev jaccard carry
                pltpu.VMEM((block_c, 1), jnp.float32),        # loss accumulator
            ],
        ),
        compiler_params=pltpu.CompilerParams(
            dimension_semantics=("parallel", "arbitrary")),
    )(gts, e_sorted, g_sorted)
    return out[:C, 0]


def lovasz_softmax(inputs, targets, reduction="mean", *, block_p=4096, block_c=8):
    """Forward pass of LovaszSoftmax.

    inputs:  (N, C, H, W) or (N, C, D, H, W) float probabilities
    targets: (N, H, W)    or (N, D, H, W)    int class labels
    """
    assert inputs.ndim in (4, 5)
    num_classes = inputs.shape[1]

    # class-major (C, P) layout, P ordered like permute(0,2,3[,4],1).view(-1,C)
    probs_cp = jnp.moveaxis(inputs, 1, 0).reshape(num_classes, -1).astype(jnp.float32)
    labels = targets.reshape(-1)                                      # (P,)
    onehot = labels[None, :] == jnp.arange(num_classes, dtype=labels.dtype)[:, None]
    # |t - p| with t in {0,1}, without materialising an f32 one-hot temporary
    errs = jnp.abs(jnp.where(onehot, 1.0 - probs_cp, probs_cp))       # (C, P) f32
    tgt_cp = onehot.astype(jnp.bfloat16)                              # exact {0,1}
    gts = jnp.bincount(labels, length=num_classes).astype(jnp.float32)[:, None]

    # TODO(synk): the descending per-class sort has no clean Pallas TPU
    # equivalent; done with one 2-operand lax.sort along the lane axis
    # (key = -err, payload = bf16 targets); sorted errors recovered from the key.
    neg_e_sorted, g_sorted = lax.sort((-errs, tgt_cp), dimension=-1, num_keys=1)
    e_sorted = -neg_e_sorted

    losses = _lovasz_losses_pallas(e_sorted, g_sorted, gts,
                                   block_p=block_p, block_c=block_c)  # (C,)

    if reduction == "none":
        return losses
    elif reduction == "sum":
        return losses.sum()
    else:
        return losses.mean()


def _reference(inputs, targets, reduction="mean"):
    """Pure-JAX reference mirroring the PyTorch module."""
    num_classes = inputs.shape[1]
    flat = jnp.transpose(inputs, (0, 2, 3, 1)).reshape(-1, num_classes)
    labels = targets.reshape(-1)
    losses = []
    for c in range(num_classes):
        tc = (labels == c).astype(jnp.float32)
        pc = flat[:, 0] if num_classes == 1 else flat[:, c]
        ec = jnp.abs(tc - pc)
        order = jnp.argsort(-ec)
        es, gs = ec[order], tc[order]
        gts = gs.sum()
        inter = gts - jnp.cumsum(gs)
        union = gts + jnp.cumsum(1.0 - gs)
        jac = 1.0 - inter / union
        grad = jnp.concatenate([jac[:1], jac[1:] - jac[:-1]])
        losses.append(jnp.dot(es, grad))
    losses = jnp.stack(losses)
    if reduction == "none":
        return losses
    if reduction == "sum":
        return losses.sum()
    return losses.mean()


if __name__ == "__main__":
    key = jax.random.PRNGKey(0)
    k1, k2 = jax.random.split(key)
    N, C, H, W = 2, 4, 16, 16
    logits = jax.random.normal(k1, (N, C, H, W), dtype=jnp.float32)
    probs = jax.nn.softmax(logits, axis=1)        # NCHW probabilities
    targets = jax.random.randint(k2, (N, H, W), 0, C, dtype=jnp.int32)

    loss = lovasz_softmax(probs, targets, reduction="mean")
    loss = jax.block_until_ready(loss)

    ref = _reference(probs, targets, reduction="mean")
    assert jnp.allclose(loss, ref, atol=1e-5), (loss, ref)
    print("KERNEL_OK")
</pallas_src>

<mosaic_0001>
module attributes {stable_mosaic.version = 11 : i64} {
  func.func @_lovasz_kernel(%arg0: i32, %arg1: i32, %arg2: memref<8x1xf32, #tpu.memory_space<vmem>>, %arg3: memref<8x512xf32, #tpu.memory_space<vmem>>, %arg4: memref<8x512xbf16, #tpu.memory_space<vmem>>, %arg5: memref<8x128xf32, #tpu.memory_space<vmem>>, %arg6: memref<256x256xbf16, #tpu.memory_space<vmem>>, %arg7: memref<1x512xf32, #tpu.memory_space<vmem>>, %arg8: memref<8x512xf32, #tpu.memory_space<vmem>>, %arg9: memref<8x1xf32, #tpu.memory_space<vmem>>, %arg10: memref<8x1xf32, #tpu.memory_space<vmem>>, %arg11: memref<8x1xf32, #tpu.memory_space<vmem>>) attributes {dimension_semantics = [#tpu.dimension_semantics<parallel>, #tpu.dimension_semantics<arbitrary>], iteration_bounds = array<i64: 1, 1>, scalar_prefetch = 0 : i64, scratch_operands = 6 : i64, tpu.core_type = #tpu.core_type<tc>, window_params = [{transform_indices = @transform_0, window_bounds = array<i64: 8, 1>}, {transform_indices = @transform_1, window_bounds = array<i64: 8, 512>}, {transform_indices = @transform_2, window_bounds = array<i64: 8, 512>}, {transform_indices = @transform_3, window_bounds = array<i64: 8, 128>}]} {
    %c0_i32 = arith.constant 0 : i32
    %0 = arith.cmpi eq, %arg1, %c0_i32 : i32
    %1 = arith.extui %0 : i1 to i32
    %c0_i32_0 = arith.constant 0 : i32
    %2 = arith.cmpi ne, %1, %c0_i32_0 : i32
    scf.if %2 {
      %56 = tpu.iota {dimensions = array<i32: 0>} : vector<256x256xi32>
      %57 = tpu.iota {dimensions = array<i32: 1>} : vector<256x256xi32>
      %58 = arith.cmpi sle, %56, %57 : vector<256x256xi32>
      %59 = arith.extui %58 : vector<256x256xi1> to vector<256x256xi32>
      %60 = arith.sitofp %59 : vector<256x256xi32> to vector<256x256xf32>
      %61 = arith.truncf %60 : vector<256x256xf32> to vector<256x256xbf16>
      %c0_35 = arith.constant 0 : index
      %c0_36 = arith.constant 0 : index
      %62 = vector.load %arg6[%c0_35, %c0_36] : memref<256x256xbf16, #tpu.memory_space<vmem>>, vector<256x256xbf16>
      tpu.vector_store %arg6[%c0_35, %c0_36], %61 {strides = array<i32>} : memref<256x256xbf16, #tpu.memory_space<vmem>>, vector<256x256xbf16>,
      %63 = tpu.iota {dimensions = array<i32: 1>} : vector<1x512xi32>
      %c1_i32_37 = arith.constant 1 : i32
      %64 = vector.broadcast %c1_i32_37 : i32 to vector<1x512xi32>
      %65 = arith.addi %63, %64 : vector<1x512xi32>
      %66 = arith.sitofp %65 : vector<1x512xi32> to vector<1x512xf32>
      %c0_38 = arith.constant 0 : index
      %c0_39 = arith.constant 0 : index
      %67 = vector.load %arg7[%c0_38, %c0_39] : memref<1x512xf32, #tpu.memory_space<vmem>>, vector<1x512xf32>
      tpu.vector_store %arg7[%c0_38, %c0_39], %66 {strides = array<i32>} : memref<1x512xf32, #tpu.memory_space<vmem>>, vector<1x512xf32>,
      %cst_40 = arith.constant 0.000000e+00 : f32
      %68 = vector.broadcast %cst_40 : f32 to vector<8x1xf32>
      %c0_41 = arith.constant 0 : index
      %c0_42 = arith.constant 0 : index
      %69 = vector.load %arg9[%c0_41, %c0_42] : memref<8x1xf32, #tpu.memory_space<vmem>>, vector<8x1xf32>
      tpu.vector_store %arg9[%c0_41, %c0_42], %68 {strides = array<i32>} : memref<8x1xf32, #tpu.memory_space<vmem>>, vector<8x1xf32>,
      %cst_43 = arith.constant 0.000000e+00 : f32
      %70 = vector.broadcast %cst_43 : f32 to vector<8x1xf32>
      %c0_44 = arith.constant 0 : index
      %c0_45 = arith.constant 0 : index
      %71 = vector.load %arg10[%c0_44, %c0_45] : memref<8x1xf32, #tpu.memory_space<vmem>>, vector<8x1xf32>
      tpu.vector_store %arg10[%c0_44, %c0_45], %70 {strides = array<i32>} : memref<8x1xf32, #tpu.memory_space<vmem>>, vector<8x1xf32>,
      %cst_46 = arith.constant 0.000000e+00 : f32
      %72 = vector.broadcast %cst_46 : f32 to vector<8x1xf32>
      %c0_47 = arith.constant 0 : index
      %c0_48 = arith.constant 0 : index
      %73 = vector.load %arg11[%c0_47, %c0_48] : memref<8x1xf32, #tpu.memory_space<vmem>>, vector<8x1xf32>
      tpu.vector_store %arg11[%c0_47, %c0_48], %72 {strides = array<i32>} : memref<8x1xf32, #tpu.memory_space<vmem>>, vector<8x1xf32>,
    } else {
    }
    %c0 = arith.constant 0 : index
    %c0_1 = arith.constant 0 : index
    %3 = vector.load %arg6[%c0, %c0_1] : memref<256x256xbf16, #tpu.memory_space<vmem>>, vector<256x256xbf16>
    %c0_2 = arith.constant 0 : index
    %c0_3 = arith.constant 0 : index
    %4 = vector.load %arg9[%c0_2, %c0_3] : memref<8x1xf32, #tpu.memory_space<vmem>>, vector<8x1xf32>
    %c0_4 = arith.constant 0 : index
    %c0_5 = arith.constant 0 : index
    %5 = vector.load %arg4[%c0_4, %c0_5] : memref<8x512xbf16, #tpu.memory_space<vmem>>, vector<8x256xbf16>
    %cst = arith.constant dense<0.000000e+00> : vector<8x256xf32>
    %6 = tpu.matmul %5, %3, %cst {dimension_numbers = #tpu.dot_dimension_numbers<[1], [0], [0], [1], [0, 0, 1, 1], [], []>} : vector<8x256xbf16>, vector<256x256xbf16>, vector<8x256xf32> -> vector<8x256xf32>
    %7 = vector.broadcast %4 : vector<8x1xf32> to vector<8x256xf32>
    %8 = arith.addf %6, %7 : vector<8x256xf32>
    %c0_6 = arith.constant 0 : index
    %c0_7 = arith.constant 0 : index
    %9 = vector.load %arg8[%c0_6, %c0_7] : memref<8x512xf32, #tpu.memory_space<vmem>>, vector<8x256xf32>
    tpu.vector_store %arg8[%c0_6, %c0_7], %8 {strides = array<i32>} : memref<8x512xf32, #tpu.memory_space<vmem>>, vector<8x256xf32>,
    %10 = vector.extract_strided_slice %8 {offsets = [0, 255], sizes = [8, 1], strides = [1, 1]} : vector<8x256xf32> to vector<8x1xf32>
    %c0_8 = arith.constant 0 : index
    %c256 = arith.constant 256 : index
    %11 = vector.load %arg4[%c0_8, %c256] : memref<8x512xbf16, #tpu.memory_space<vmem>>, vector<8x256xbf16>
    %cst_9 = arith.constant dense<0.000000e+00> : vector<8x256xf32>
    %12 = tpu.matmul %11, %3, %cst_9 {dimension_numbers = #tpu.dot_dimension_numbers<[1], [0], [0], [1], [0, 0, 1, 1], [], []>} : vector<8x256xbf16>, vector<256x256xbf16>, vector<8x256xf32> -> vector<8x256xf32>
    %13 = vector.broadcast %10 : vector<8x1xf32> to vector<8x256xf32>
    %14 = arith.addf %12, %13 : vector<8x256xf32>
    %c0_10 = arith.constant 0 : index
    %c256_11 = arith.constant 256 : index
    %15 = vector.load %arg8[%c0_10, %c256_11] : memref<8x512xf32, #tpu.memory_space<vmem>>, vector<8x256xf32>
    tpu.vector_store %arg8[%c0_10, %c256_11], %14 {strides = array<i32>} : memref<8x512xf32, #tpu.memory_space<vmem>>, vector<8x256xf32>,
    %16 = vector.extract_strided_slice %14 {offsets = [0, 255], sizes = [8, 1], strides = [1, 1]} : vector<8x256xf32> to vector<8x1xf32>
    %c0_12 = arith.constant 0 : index
    %c0_13 = arith.constant 0 : index
    %17 = vector.load %arg9[%c0_12, %c0_13] : memref<8x1xf32, #tpu.memory_space<vmem>>, vector<8x1xf32>
    tpu.vector_store %arg9[%c0_12, %c0_13], %16 {strides = array<i32>} : memref<8x1xf32, #tpu.memory_space<vmem>>, vector<8x1xf32>,
    %c0_14 = arith.constant 0 : index
    %c0_15 = arith.constant 0 : index
    %18 = vector.load %arg3[%c0_14, %c0_15] : memref<8x512xf32, #tpu.memory_space<vmem>>, vector<8x512xf32>
    %c0_16 = arith.constant 0 : index
    %c0_17 = arith.constant 0 : index
    %19 = vector.load %arg2[%c0_16, %c0_17] : memref<8x1xf32, #tpu.memory_space<vmem>>, vector<8x1xf32>
    %c0_18 = arith.constant 0 : index
    %c0_19 = arith.constant 0 : index
    %20 = vector.load %arg8[%c0_18, %c0_19] : memref<8x512xf32, #tpu.memory_space<vmem>>, vector<8x512xf32>
    %c0_20 = arith.constant 0 : index
    %c0_21 = arith.constant 0 : index
    %21 = vector.load %arg7[%c0_20, %c0_21] : memref<1x512xf32, #tpu.memory_space<vmem>>, vector<1x512xf32>
    %c512_i32 = arith.constant 512 : i32
    %22 = arith.muli %arg1, %c512_i32 : i32
    %23 = arith.sitofp %22 : i32 to f32
    %24 = vector.broadcast %23 : f32 to vector<1x512xf32>
    %25 = arith.addf %21, %24 : vector<1x512xf32>
    %26 = vector.broadcast %19 : vector<8x1xf32> to vector<8x512xf32>
    %27 = arith.subf %26, %20 : vector<8x512xf32>
    %28 = vector.broadcast %25 : vector<1x512xf32> to vector<8x512xf32>
    %29 = arith.subf %28, %20 : vector<8x512xf32>
    %30 = vector.broadcast %19 : vector<8x1xf32> to vector<8x512xf32>
    %31 = arith.addf %30, %29 : vector<8x512xf32>
    %32 = arith.divf %27, %31 : vector<8x512xf32>
    %cst_22 = arith.constant 1.000000e+00 : f32
    %33 = vector.broadcast %cst_22 : f32 to vector<8x512xf32>
    %34 = arith.subf %33, %32 : vector<8x512xf32>
    %c1_i32 = arith.constant 1 : i32
    %35 = tpu.dynamic_rotate %34 by %c1_i32 dim 1 : vector<8x512xf32>, i32 -> vector<8x512xf32>
    %c0_23 = arith.constant 0 : index
    %c0_24 = arith.constant 0 : index
    %36 = vector.load %arg10[%c0_23, %c0_24] : memref<8x1xf32, #tpu.memory_space<vmem>>, vector<8x1xf32>
    %37 = vector.shape_cast %36 : vector<8x1xf32> to vector<8x1xf32>
    %38 = vector.broadcast %37 : vector<8x1xf32> to vector<8x512xf32>
    %cst_25 = arith.constant 1.000000e+00 : f32
    %39 = vector.broadcast %cst_25 : f32 to vector<1x512xf32>
    %40 = arith.cmpf oeq, %21, %39 : vector<1x512xf32>
    %41 = vector.shape_cast %40 : vector<1x512xi1> to vector<1x512xi1>
    %42 = vector.broadcast %41 : vector<1x512xi1> to vector<8x512xi1>
    %43 = arith.select %42, %38, %35 : vector<8x512xi1>, vector<8x512xf32>
    %44 = arith.subf %34, %43 : vector<8x512xf32>
    %c0_26 = arith.constant 0 : index
    %c0_27 = arith.constant 0 : index
    %45 = vector.load %arg11[%c0_26, %c0_27] : memref<8x1xf32, #tpu.memory_space<vmem>>, vector<8x1xf32>
    %46 = arith.mulf %18, %44 : vector<8x512xf32>
    %cst_28 = arith.constant dense<0.000000e+00> : vector<8xf32>
    %47 = vector.multi_reduction <add>, %46, %cst_28 [1] : vector<8x512xf32> to vector<8xf32>
    %48 = vector.shape_cast %47 : vector<8xf32> to vector<8x1xf32>
    %49 = arith.addf %45, %48 : vector<8x1xf32>
    %c0_29 = arith.constant 0 : index
    %c0_30 = arith.constant 0 : index
    %50 = vector.load %arg11[%c0_29, %c0_30] : memref<8x1xf32, #tpu.memory_space<vmem>>, vector<8x1xf32>
    tpu.vector_store %arg11[%c0_29, %c0_30], %49 {strides = array<i32>} : memref<8x1xf32, #tpu.memory_space<vmem>>, vector<8x1xf32>,
    %51 = vector.extract_strided_slice %34 {offsets = [0, 511], sizes = [8, 1], strides = [1, 1]} : vector<8x512xf32> to vector<8x1xf32>
    %c0_31 = arith.constant 0 : index
    %c0_32 = arith.constant 0 : index
    %52 = vector.load %arg10[%c0_31, %c0_32] : memref<8x1xf32, #tpu.memory_space<vmem>>, vector<8x1xf32>
    tpu.vector_store %arg10[%c0_31, %c0_32], %51 {strides = array<i32>} : memref<8x1xf32, #tpu.memory_space<vmem>>, vector<8x1xf32>,
    %c0_i32_33 = arith.constant 0 : i32
    %53 = arith.cmpi eq, %arg1, %c0_i32_33 : i32
    %54 = arith.extui %53 : i1 to i32
    %c0_i32_34 = arith.constant 0 : i32
    %55 = arith.cmpi ne, %54, %c0_i32_34 : i32
    scf.if %55 {
      %c0_35 = arith.constant 0 : index
      %c0_36 = arith.constant 0 : index
      %56 = vector.load %arg11[%c0_35, %c0_36] : memref<8x1xf32, #tpu.memory_space<vmem>>, vector<8x1xf32>
      %57 = vector.shape_cast %56 : vector<8x1xf32> to vector<8x1xf32>
      %58 = vector.broadcast %57 : vector<8x1xf32> to vector<8x128xf32>
      %c0_37 = arith.constant 0 : index
      %c0_38 = arith.constant 0 : index
      %59 = vector.load %arg5[%c0_37, %c0_38] : memref<8x128xf32, #tpu.memory_space<vmem>>, vector<8x128xf32>
      tpu.vector_store %arg5[%c0_37, %c0_38], %58 {strides = array<i32>} : memref<8x128xf32, #tpu.memory_space<vmem>>, vector<8x128xf32>,
    } else {
    }
    return
  }
  func.func @transform_0(%arg0: i32, %arg1: i32) -> (i32, i32) {
    %c0_i32 = arith.constant 0 : i32
    %c0_i32_0 = arith.constant 0 : i32
    return %arg0, %c0_i32 : i32, i32
  }
  func.func @transform_1(%arg0: i32, %arg1: i32) -> (i32, i32) {
    %c0_i32 = arith.constant 0 : i32
    return %arg0, %arg1 : i32, i32
  }
  func.func @transform_2(%arg0: i32, %arg1: i32) -> (i32, i32) {
    %c0_i32 = arith.constant 0 : i32
    return %arg0, %arg1 : i32, i32
  }
  func.func @transform_3(%arg0: i32, %arg1: i32) -> (i32, i32) {
    %c0_i32 = arith.constant 0 : i32
    %c0_i32_0 = arith.constant 0 : i32
    return %arg0, %c0_i32 : i32, i32
  }
}

</mosaic_0001>

<bundles_post_ra>
// kernel: tpu_custom_call.1
= control target key start
LH: loop header
LB: loop body
LE: loop exit
PB: predicated region body
PF: predicated region fallthrough
CT: control target
= control target key end

     0   :  { %8 = vsyncpa [#allocation9], 0  ;;  %s1537_s0 = inlined_call_operand.vmem [shape: f32[8,1], index: 0, kind: input, shape index: {}]   ;;  %s1538_s1 = inlined_call_operand.hbm [shape: f32[8,512], index: 1, kind: input, shape index: {}]   ;;  %s1539_s2 = inlined_call_operand.hbm [shape: bf16[8,512], index: 2, kind: input, shape index: {}]   ;;  %s1540_s3 = inlined_call_operand.hbm [shape: f32[8,128], index: 3, kind: output, shape index: {}]  }
   0x1   :  { %9 = vsyncpa [#allocation12], 0 }
   0x2   :  { %10 = vsyncpa [#allocation10], 0  ;;  %s18_s14 = sshll.u32 %s1538_s1, 4  ;;  %s1182_s15 = smov [#allocation8]   ;;  %s19_s14 = int_to_ptr.hbm [resolvable:$true] %s18_s14 }
   0x3   :  { %s20_s16 = sshll.u32 %s1182_s15, 4  ;;  %s29_s19 = sshll.u32 %s1539_s2, 4  ;;  %s21_s16 = int_to_ptr.vmem [resolvable:$true] %s20_s16  ;;  %s30_s19 = int_to_ptr.hbm [resolvable:$true] %s29_s19 }
   0x4   :  { %23 = dma.hbm_to_vmem [thread:$0]  %s19_s14, 512, %s21_s16, [#allocation9]  }
   0x5   :  { %s1183_s20 = smov [#allocation11]  }
   0x6   :  { %s31_s21 = sshll.u32 %s1183_s20, 4  ;;  %s32_s21 = int_to_ptr.vmem [resolvable:$true] %s31_s21 }
   0x7   :  { %34 = dma.hbm_to_vmem [thread:$0]  %s30_s19, 256, %s32_s21, [#allocation12]  }
   0x8   :  { %1176 = dma.done.wait [#allocation9], 512  }
   0x9   :  { %1177 = vsyncadd [#allocation9], 4294966784 }
   0xa   :  { %1178 = dma.done.wait [#allocation12], 256  }
   0xb   :  { %1179 = vsyncadd [#allocation12], 4294967040  ;;  %v47_v0 = vlaneseq  ;;  %v1184_v13 = vmov 0.0   ;;  %s1188_s22 = smov [#allocation13]   ;;  %s882_s26 = sshll.u32 %s1540_s3, 4  ;;  %s883_s26 = int_to_ptr.hbm [resolvable:$true] %s882_s26 }
   0xc   :  { %s880_s23 = sshll.u32 %s1188_s22, 4  ;;  %s881_s23 = int_to_ptr.vmem [resolvable:$true] %s880_s23 }
   0xd   :  { %v1216_v1 = vshrl.u32 %v47_v0, 7  ;;  %v1219_v2 = vand.u32 127, %v47_v0 }
   0xf   :  { %v62_v3 = vadd.s32 112, %v1216_v1  ;;  %v63_v4 = vadd.s32 120, %v1216_v1  ;;  %v78_v5 = vadd.s32 240, %v1216_v1  ;;  %v79_v6 = vadd.s32 248, %v1216_v1 }
  0x10   :  { %v1226_v7 = vadd.s32 128, %v1219_v2  ;;  %v60_v8 = vadd.s32 96, %v1216_v1  ;;  %v61_v9 = vadd.s32 104, %v1216_v1  ;;  %v76_v10 = vadd.s32 224, %v1216_v1 }
  0x11   :  { %vm111_vm0 = vcmp.le.s32.totalorder %v62_v3, %v1219_v2  ;;  %vm113_vm1 = vcmp.le.s32.totalorder %v63_v4, %v1219_v2  ;;  %v77_v11 = vadd.s32 232, %v1216_v1  ;;  %v58_v12 = vadd.s32 80, %v1216_v1 }
  0x12   :  { %v907_v14 = vsel %vm111_vm0, 1.0, %v1184_v13  ;;  %v908_v15 = vsel %vm113_vm1, 1.0, %v1184_v13  ;;  %vm144_vm2 = vcmp.le.s32.totalorder %v78_v5, %v1226_v7  ;;  %vm146_vm3 = vcmp.le.s32.totalorder %v79_v6, %v1226_v7 }
  0x13   :  { %v289_v16 = vpack.c.bf16 1.0, %v907_v14  ;;  %v290_v17 = vpack.c.bf16 1.0, %v908_v15  ;;  %v923_v18 = vsel %vm144_vm2, 1.0, %v1184_v13  ;;  %v924_v19 = vsel %vm146_vm3, 1.0, %v1184_v13 }
  0x14   :  { %v305_v20 = vpack.c.bf16 %v923_v18, %v1184_v13  ;;  %v306_v21 = vpack.c.bf16 %v924_v19, %v1184_v13  ;;  %vm107_vm4 = vcmp.le.s32.totalorder %v60_v8, %v1219_v2  ;;  %vm109_vm5 = vcmp.le.s32.totalorder %v61_v9, %v1219_v2 }
  0x15   :  { %321 = vst [vmem:[#allocation2 + $0x70] sm:$0xff] %v289_v16  ;;  %v905_v22 = vsel %vm107_vm4, 1.0, %v1184_v13  ;;  %v906_v23 = vsel %vm109_vm5, 1.0, %v1184_v13  ;;  %vm140_vm6 = vcmp.le.s32.totalorder %v76_v10, %v1226_v7  ;;  %vm142_vm7 = vcmp.le.s32.totalorder %v77_v11, %v1226_v7 }
  0x16   :  { %322 = vst [vmem:[#allocation2 + $0x78] sm:$0xff] %v290_v17  ;;  %v287_v24 = vpack.c.bf16 1.0, %v905_v22  ;;  %v288_v25 = vpack.c.bf16 1.0, %v906_v23  ;;  %v921_v26 = vsel %vm140_vm6, 1.0, %v1184_v13  ;;  %v922_v27 = vsel %vm142_vm7, 1.0, %v1184_v13 }
  0x17   :  { %337 = vst [vmem:[#allocation2 + $0xf0] sm:$0xff] %v305_v20  ;;  %v303_v28 = vpack.c.bf16 %v921_v26, %v1184_v13  ;;  %v304_v29 = vpack.c.bf16 %v922_v27, %v1184_v13  ;;  %v59_v30 = vadd.s32 88, %v1216_v1  ;;  %vm103_vm8 = vcmp.le.s32.totalorder %v58_v12, %v1219_v2 }
  0x18   :  { %338 = vst [vmem:[#allocation2 + $0xf8] sm:$0xff] %v306_v21  ;;  %v903_v31 = vsel %vm103_vm8, 1.0, %v1184_v13  ;;  %v74_v32 = vadd.s32 208, %v1216_v1  ;;  %v75_v33 = vadd.s32 216, %v1216_v1  ;;  %v56_v34 = vadd.s32 64, %v1216_v1 }
  0x19   :  { %319 = vst [vmem:[#allocation2 + $0x60] sm:$0xff] %v287_v24  ;;  %vm105_vm9 = vcmp.le.s32.totalorder %v59_v30, %v1219_v2  ;;  %v285_v35 = vpack.c.bf16 1.0, %v903_v31  ;;  %v57_v36 = vadd.s32 72, %v1216_v1  ;;  %v72_v37 = vadd.s32 192, %v1216_v1 }
  0x1a   :  { %320 = vst [vmem:[#allocation2 + $0x68] sm:$0xff] %v288_v25  ;;  %v904_v38 = vsel %vm105_vm9, 1.0, %v1184_v13  ;;  %vm136_vm10 = vcmp.le.s32.totalorder %v74_v32, %v1226_v7  ;;  %vm138_vm11 = vcmp.le.s32.totalorder %v75_v33, %v1226_v7  ;;  %vm99_vm12 = vcmp.le.s32.totalorder %v56_v34, %v1219_v2 }
  0x1b   :  { %335 = vst [vmem:[#allocation2 + $0xe0] sm:$0xff] %v303_v28  ;;  %v286_v39 = vpack.c.bf16 1.0, %v904_v38  ;;  %v919_v40 = vsel %vm136_vm10, 1.0, %v1184_v13  ;;  %v920_v41 = vsel %vm138_vm11, 1.0, %v1184_v13  ;;  %vm101_vm13 = vcmp.le.s32.totalorder %v57_v36, %v1219_v2 }
  0x1c   :  { %v983_v42 = vld [vmem:[#allocation2 + $0x70] sm:$0xf]  ;;  %v1067_v43 = vld [vmem:[#allocation2 + $0x74] sm:$0xf]  ;;  %336 = vst [vmem:[#allocation2 + $0xe8] sm:$0xff] %v304_v29  ;;  %v301_v44 = vpack.c.bf16 %v919_v40, %v1184_v13  ;;  %v302_v45 = vpack.c.bf16 %v920_v41, %v1184_v13  ;;  %v901_v46 = vsel %vm99_vm12, 1.0, %v1184_v13  ;;  %vm132_vm14 = vcmp.le.s32.totalorder %v72_v37, %v1226_v7 }
  0x1d   :  { %v1068_v47 = vld [vmem:[#allocation2 + $0x74] sm:$0xf0]  ;;  %v985_v48 = vld [vmem:[#allocation2 + $0x78] sm:$0xf0]  ;;  %317 = vst [vmem:[#allocation2 + $0x50] sm:$0xff] %v285_v35  ;;  %v902_v49 = vsel %vm101_vm13, 1.0, %v1184_v13  ;;  %vm83_vm10 = vcmp.le.s32.totalorder %v1216_v1, %v1219_v2 }
  0x1e   :  { %v1273_v50 = vor.u32 %v1068_v47, %v983_v42  ;;  %v1275_v51 = vor.u32 %v1067_v43, %v985_v48  ;;  %v1083_v52 = vld [vmem:[#allocation2 + $0xf4] sm:$0xf]  ;;  %v1047_v53 = vld [vmem:[#allocation2 + $0xf0] sm:$0xf]  ;;  %318 = vst [vmem:[#allocation2 + $0x58] sm:$0xff] %v286_v39  ;;  %v283_v54 = vpack.c.bf16 1.0, %v901_v46 }
  0x1f   :  { %v1049_v55 = vld [vmem:[#allocation2 + $0xf8] sm:$0xf0]  ;;  %v1084_v56 = vld [vmem:[#allocation2 + $0xf4] sm:$0xf0]  ;;  %333 = vst [vmem:[#allocation2 + $0xd0] sm:$0xff] %v301_v44  ;;  %v284_v57 = vpack.c.bf16 1.0, %v902_v49 }
  0x20   :  { %578 = vmatpush.bf16.msra.mxu0 %v1273_v50  ;;  %604 = vmatpush.bf16.msra.mxu2 %v1275_v51  ;;  %v1280_v58 = vor.u32 %v1083_v52, %v1049_v55  ;;  %v1282_v59 = vor.u32 %v1084_v56, %v1047_v53  ;;  %v975_v60 = vld [vmem:[#allocation2 + $0x60] sm:$0xf]  ;;  %v1065_v61 = vld [vmem:[#allocation2 + $0x64] sm:$0xf]  ;;  %334 = vst [vmem:[#allocation2 + $0xd8] sm:$0xff] %v302_v45  ;;  %v73_v62 = vadd.s32 200, %v1216_v1 }
  0x21   :  { %v1066_v63 = vld [vmem:[#allocation2 + $0x64] sm:$0xf0]  ;;  %v977_v3 = vld [vmem:[#allocation2 + $0x68] sm:$0xf0]  ;;  %315 = vst [vmem:[#allocation2 + $0x40] sm:$0xff] %v283_v54  ;;  %v917_v4 = vsel %vm132_vm14, 1.0, %v1184_v13 }
  0x22   :  { %617 = vmatpush.bf16.msra.mxu3 %v1280_v58  ;;  %591 = vmatpush.bf16.msra.mxu1 %v1282_v59  ;;  %v1290_v5 = vor.u32 %v1066_v63, %v975_v60  ;;  %v1292_v6 = vor.u32 %v1065_v61, %v977_v3  ;;  %v1081_v8 = vld [vmem:[#allocation2 + $0xe4] sm:$0xf]  ;;  %v1039_v9 = vld [vmem:[#allocation2 + $0xe0] sm:$0xf]  ;;  %316 = vst [vmem:[#allocation2 + $0x48] sm:$0xff] %v284_v57  ;;  %v54_v15 = vadd.s32 48, %v1216_v1 }
  0x23   :  { %vm134_vm15 = vcmp.le.s32.totalorder %v73_v62, %v1226_v7  ;;  %v1041_v10 = vld [vmem:[#allocation2 + $0xe8] sm:$0xf0]  ;;  %v1082_v11 = vld [vmem:[#allocation2 + $0xe4] sm:$0xf0]  ;;  %v299_v14 = vpack.c.bf16 %v917_v4, %v1184_v13  ;;  %v55_v21 = vadd.s32 56, %v1216_v1  ;;  %v70_v24 = vadd.s32 176, %v1216_v1 }
  0x24   :  { %v918_v12 = vsel %vm134_vm15, 1.0, %v1184_v13  ;;  %579 = vmatpush.bf16.msra.mxu0 %v1290_v5  ;;  %605 = vmatpush.bf16.msra.mxu2 %v1292_v6  ;;  %v1300_v16 = vor.u32 %v1081_v8, %v1041_v10  ;;  %v1302_v17 = vor.u32 %v1082_v11, %v1039_v9  ;;  %v967_v18 = vld [vmem:[#allocation2 + $0x50] sm:$0xf]  ;;  %v1063_v19 = vld [vmem:[#allocation2 + $0x54] sm:$0xf]  ;;  %vm95_vm0 = vcmp.le.s32.totalorder %v54_v15, %v1219_v2 }
  0x25   :  { %v300_v20 = vpack.c.bf16 %v918_v12, %v1184_v13  ;;  %v1064_v22 = vld [vmem:[#allocation2 + $0x54] sm:$0xf0]  ;;  %v969_v23 = vld [vmem:[#allocation2 + $0x58] sm:$0xf0]  ;;  %331 = vst [vmem:[#allocation2 + $0xc0] sm:$0xff] %v299_v14  ;;  %vm97_vm1 = vcmp.le.s32.totalorder %v55_v21, %v1219_v2  ;;  %v899_v31 = vsel %vm95_vm0, 1.0, %v1184_v13  ;;  %vm128_vm2 = vcmp.le.s32.totalorder %v70_v24, %v1226_v7 }
  0x26   :  { %618 = vmatpush.bf16.msra.mxu3 %v1300_v16  ;;  %592 = vmatpush.bf16.msra.mxu1 %v1302_v17  ;;  %v1310_v25 = vor.u32 %v1064_v22, %v967_v18  ;;  %v1312_v26 = vor.u32 %v1063_v19, %v969_v23  ;;  %v1079_v27 = vld [vmem:[#allocation2 + $0xd4] sm:$0xf]  ;;  %v1031_v28 = vld [vmem:[#allocation2 + $0xd0] sm:$0xf]  ;;  %v900_v32 = vsel %vm97_vm1, 1.0, %v1184_v13  ;;  %v281_v37 = vpack.c.bf16 1.0, %v899_v31 }
  0x27   :  { %332 = vst [vmem:[#allocation2 + $0xc8] sm:$0xff] %v300_v20  ;;  %v1033_v29 = vld [vmem:[#allocation2 + $0xd8] sm:$0xf0]  ;;  %v1080_v30 = vld [vmem:[#allocation2 + $0xd4] sm:$0xf0]  ;;  %v282_v38 = vpack.c.bf16 1.0, %v900_v32 }
  0x28   :  { %580 = vmatpush.bf16.msra.mxu0 %v1310_v25  ;;  %606 = vmatpush.bf16.msra.mxu2 %v1312_v26  ;;  %v1320_v33 = vor.u32 %v1079_v27, %v1033_v29  ;;  %v1322_v34 = vor.u32 %v1080_v30, %v1031_v28  ;;  %v959_v35 = vld [vmem:[#allocation2 + $0x40] sm:$0xf]  ;;  %v1061_v36 = vld [vmem:[#allocation2 + $0x44] sm:$0xf]  ;;  %v71_v41 = vadd.s32 184, %v1216_v1  ;;  %v915_v42 = vsel %vm128_vm2, 1.0, %v1184_v13 }
  0x29   :  { %v1062_v39 = vld [vmem:[#allocation2 + $0x44] sm:$0xf0]  ;;  %v961_v40 = vld [vmem:[#allocation2 + $0x48] sm:$0xf0]  ;;  %313 = vst [vmem:[#allocation2 + $0x30] sm:$0xff] %v281_v37  ;;  %v297_v45 = vpack.c.bf16 %v915_v42, %v1184_v13  ;;  %v52_v46 = vadd.s32 32, %v1216_v1 }
  0x2a   :  { %619 = vmatpush.bf16.msra.mxu3 %v1320_v33  ;;  %593 = vmatpush.bf16.msra.mxu1 %v1322_v34  ;;  %v1328_v43 = vor.u32 %v1062_v39, %v959_v35  ;;  %v1330_v44 = vor.u32 %v1061_v36, %v961_v40  ;;  %314 = vst [vmem:[#allocation2 + $0x38] sm:$0xff] %v282_v38  ;;  %v53_v47 = vadd.s32 40, %v1216_v1  ;;  %v68_v48 = vadd.s32 160, %v1216_v1 }
  0x2b   :  { %vm130_vm3 = vcmp.le.s32.totalorder %v71_v41, %v1226_v7  ;;  %329 = vst [vmem:[#allocation2 + $0xb0] sm:$0xff] %v297_v45  ;;  %vm91_vm4 = vcmp.le.s32.totalorder %v52_v46, %v1219_v2  ;;  %v69_v57 = vadd.s32 168, %v1216_v1  ;;  %v50_v10 = vadd.s32 16, %v1216_v1 }
  0x2c   :  { %581 = vmatpush.bf16.msra.mxu0 %v1328_v43  ;;  %607 = vmatpush.bf16.msra.mxu2 %v1330_v44  ;;  %v1077_v49 = vld [vmem:[#allocation2 + $0xc4] sm:$0xf]  ;;  %v1023_v52 = vld [vmem:[#allocation2 + $0xc0] sm:$0xf]  ;;  %v916_v53 = vsel %vm130_vm3, 1.0, %v1184_v13  ;;  %vm93_vm5 = vcmp.le.s32.totalorder %v53_v47, %v1219_v2  ;;  %v897_v62 = vsel %vm91_vm4, 1.0, %v1184_v13  ;;  %vm124_vm6 = vcmp.le.s32.totalorder %v68_v48, %v1226_v7 }
  0x2d   :  { %v298_v56 = vpack.c.bf16 %v916_v53, %v1184_v13  ;;  %v898_v63 = vsel %vm93_vm5, 1.0, %v1184_v13  ;;  %v279_v3 = vpack.c.bf16 1.0, %v897_v62  ;;  %vm126_vm7 = vcmp.le.s32.totalorder %v69_v57, %v1226_v7 }
  0x2e   :  { %v1025_v54 = vld [vmem:[#allocation2 + $0xc8] sm:$0xf0]  ;;  %v1078_v55 = vld [vmem:[#allocation2 + $0xc4] sm:$0xf0]  ;;  %v280_v4 = vpack.c.bf16 1.0, %v898_v63  ;;  %v913_v8 = vsel %vm124_vm6, 1.0, %v1184_v13  ;;  %vm87_vm8 = vcmp.le.s32.totalorder %v50_v10, %v1219_v2 }
  0x2f   :  { %v1344_v60 = vor.u32 %v1077_v49, %v1025_v54  ;;  %v1346_v61 = vor.u32 %v1078_v55, %v1023_v52  ;;  %330 = vst [vmem:[#allocation2 + $0xb8] sm:$0xff] %v298_v56  ;;  %v914_v9 = vsel %vm126_vm7, 1.0, %v1184_v13  ;;  %v51_v11 = vadd.s32 24, %v1216_v1 }
  0x30   :  { %v951_v12 = vld [vmem:[#allocation2 + $0x30] sm:$0xf]  ;;  %v1059_v14 = vld [vmem:[#allocation2 + $0x34] sm:$0xf]  ;;  %311 = vst [vmem:[#allocation2 + $0x20] sm:$0xff] %v279_v3  ;;  %v295_v15 = vpack.c.bf16 %v913_v8, %v1184_v13  ;;  %v296_v18 = vpack.c.bf16 %v914_v9, %v1184_v13  ;;  %v66_v19 = vadd.s32 144, %v1216_v1 }
  0x31   :  { %620 = vmatpush.bf16.msra.mxu3 %v1344_v60  ;;  %594 = vmatpush.bf16.msra.mxu1 %v1346_v61  ;;  %v1060_v20 = vld [vmem:[#allocation2 + $0x34] sm:$0xf0]  ;;  %v953_v21 = vld [vmem:[#allocation2 + $0x38] sm:$0xf0]  ;;  %312 = vst [vmem:[#allocation2 + $0x28] sm:$0xff] %v280_v4  ;;  %vm89_vm9 = vcmp.le.s32.totalorder %v51_v11, %v1219_v2  ;;  %v67_v22 = vadd.s32 152, %v1216_v1 }
  0x32   :  { %v1366_v23 = vor.u32 %v1060_v20, %v951_v12  ;;  %v1368_v24 = vor.u32 %v1059_v14, %v953_v21  ;;  %v1075_v27 = vld [vmem:[#allocation2 + $0xb4] sm:$0xf]  ;;  %327 = vst [vmem:[#allocation2 + $0xa0] sm:$0xff] %v295_v15  ;;  %v895_v28 = vsel %vm87_vm8, 1.0, %v1184_v13  ;;  %vm120_vm11 = vcmp.le.s32.totalorder %v66_v19, %v1226_v7  ;;  %v1015_v29 = vld [vmem:[#allocation2 + $0xb0] sm:$0xf] }
  0x33   :  { %328 = vst [vmem:[#allocation2 + $0xa8] sm:$0xff] %v296_v18  ;;  %v896_v30 = vsel %vm89_vm9, 1.0, %v1184_v13  ;;  %v277_v31 = vpack.c.bf16 1.0, %v895_v28  ;;  %vm122_vm12 = vcmp.le.s32.totalorder %v67_v22, %v1226_v7  ;;  %v911_v32 = vsel %vm120_vm11, 1.0, %v1184_v13  ;;  %v1406_v12 = vld [vmem:[#allocation11] sm:$0xff] }
  0x34   :  { %582 = vmatpush.bf16.msra.mxu0 %v1366_v23  ;;  %608 = vmatpush.bf16.msra.mxu2 %v1368_v24  ;;  %v278_v35 = vpack.c.bf16 1.0, %v896_v30  ;;  %v912_v36 = vsel %vm122_vm12, 1.0, %v1184_v13  ;;  %v293_v37 = vpack.c.bf16 %v911_v32, %v1184_v13  ;;  %v49_v38 = vadd.s32 8, %v1216_v1  ;;  %v709_v14 = vld [vmem:[%s1537_s0] sm:$0xff]  ;;  %s1187_s0 = smov 1  }
  0x35   :  { %309 = vst [vmem:[#allocation2 + $0x10] sm:$0xff] %v277_v31  ;;  %v294_v41 = vpack.c.bf16 %v912_v36, %v1184_v13  ;;  %v893_v42 = vsel %vm83_vm10, 1.0, %v1184_v13  ;;  %v64_v3 = vadd.s32 128, %v1216_v1  ;;  %v65_v9 = vadd.s32 136, %v1216_v1 }
  0x36   :  { %v1017_v39 = vld [vmem:[#allocation2 + $0xb8] sm:$0xf0]  ;;  %v1076_v40 = vld [vmem:[#allocation2 + $0xb4] sm:$0xf0]  ;;  %310 = vst [vmem:[#allocation2 + $0x18] sm:$0xff] %v278_v35  ;;  %vm85_vm13 = vcmp.le.s32.totalorder %v49_v38, %v1219_v2  ;;  %v275_v47 = vpack.c.bf16 1.0, %v893_v42 }
  0x37   :  { %v1385_v45 = vor.u32 %v1075_v27, %v1017_v39  ;;  %v1387_v46 = vor.u32 %v1076_v40, %v1015_v29  ;;  %v943_v48 = vld [vmem:[#allocation2 + $0x20] sm:$0xf]  ;;  %v1057_v49 = vld [vmem:[#allocation2 + $0x24] sm:$0xf]  ;;  %325 = vst [vmem:[#allocation2 + $0x90] sm:$0xff] %v293_v37  ;;  %v894_v52 = vsel %vm85_vm13, 1.0, %v1184_v13  ;;  %vm116_vm14 = vcmp.le.s32.totalorder %v64_v3, %v1226_v7 }
  0x38   :  { %v1058_v53 = vld [vmem:[#allocation2 + $0x24] sm:$0xf0]  ;;  %v945_v54 = vld [vmem:[#allocation2 + $0x28] sm:$0xf0]  ;;  %326 = vst [vmem:[#allocation2 + $0x98] sm:$0xff] %v294_v41  ;;  %v276_v55 = vpack.c.bf16 1.0, %v894_v52  ;;  %vm118_vm15 = vcmp.le.s32.totalorder %v65_v9, %v1226_v7  ;;  %v412_v40 = vunpack.c.l.b16 %v1406_v12 }
  0x39   :  { %621 = vmatpush.bf16.msra.mxu3 %v1385_v45  ;;  %595 = vmatpush.bf16.msra.mxu1 %v1387_v46  ;;  %v1393_v56 = vor.u32 %v1058_v53, %v943_v48  ;;  %v1395_v57 = vor.u32 %v1057_v49, %v945_v54  ;;  %v1073_v62 = vld [vmem:[#allocation2 + $0xa4] sm:$0xf]  ;;  %v1007_v63 = vld [vmem:[#allocation2 + $0xa0] sm:$0xf]  ;;  %307 = vst [vmem:[#allocation2] sm:$0xff] %v275_v47  ;;  %v909_v1 = vsel %vm116_vm14, 1.0, %v1184_v13 }
  0x3a   :  { %v1009_v4 = vld [vmem:[#allocation2 + $0xa8] sm:$0xf0]  ;;  %v1074_v8 = vld [vmem:[#allocation2 + $0xa4] sm:$0xf0]  ;;  %308 = vst [vmem:[#allocation2 + $0x8] sm:$0xff] %v276_v55  ;;  %v1185_v19 = vmov 0   ;;  %v291_v28 = vpack.c.bf16 %v909_v1, %v1184_v13 }
  0x3b   :  { %583 = vmatpush.bf16.msra.mxu0 %v1393_v56  ;;  %609 = vmatpush.bf16.msra.mxu2 %v1395_v57  ;;  %v1401_v10 = vor.u32 %v1073_v62, %v1009_v4  ;;  %v1403_v11 = vor.u32 %v1074_v8, %v1007_v63  ;;  %v339_v20 = vadd.s32 256, %v1219_v2  ;;  %v910_v27 = vsel %vm118_vm15, 1.0, %v1184_v13 }
  0x3c   :  { %v935_v15 = vld [vmem:[#allocation2 + $0x10] sm:$0xf]  ;;  %v1055_v18 = vld [vmem:[#allocation2 + $0x14] sm:$0xf]  ;;  %1092 = vset.pattern.permute.xlu0 %v1185_v19  ;;  %1094 = vset.pattern.permute.xlu1 %v1185_v19  ;;  %v340_v29 = vadd.s32 384, %v1219_v2  ;;  %v292_v36 = vpack.c.bf16 %v910_v27, %v1184_v13  ;;  %v341_v37 = vadd.s32 1, %v1219_v2  ;;  %v414_v8 = vpack.c.b16 %v412_v40, %v412_v40 }
  0x3d   :  { %622 = vmatpush.bf16.msra.mxu3 %v1401_v10  ;;  %596 = vmatpush.bf16.msra.mxu1 %v1403_v11  ;;  %v1056_v21 = vld [vmem:[#allocation2 + $0x14] sm:$0xf0]  ;;  %v937_v22 = vld [vmem:[#allocation2 + $0x18] sm:$0xf0]  ;;  %323 = vst [vmem:[#allocation2 + $0x80] sm:$0xff] %v291_v28  ;;  %v342_v41 = vadd.s32 1, %v1226_v7 }
  0x3e   :  { %v1421_v30 = vor.u32 %v1056_v21, %v935_v15  ;;  %v1423_v31 = vor.u32 %v1055_v18, %v937_v22  ;;  %v1071_v32 = vld [vmem:[#allocation2 + $0x94] sm:$0xf]  ;;  %v999_v35 = vld [vmem:[#allocation2 + $0x90] sm:$0xf]  ;;  %721 = vperm.xlu1 %1094, %v709_v14   ;;  %324 = vst [vmem:[#allocation2 + $0x88] sm:$0xff] %v292_v36  ;;  %v343_v52 = vadd.s32 1, %v339_v20  ;;  %v345_v62 = vcvt.s32.f32 %v341_v37 }
  0x3f   :  { %v1001_v38 = vld [vmem:[#allocation2 + $0x98] sm:$0xf0]  ;;  %v1072_v39 = vld [vmem:[#allocation2 + $0x94] sm:$0xf0]  ;;  %v344_v55 = vadd.s32 1, %v340_v29  ;;  %v346_v63 = vcvt.s32.f32 %v342_v41  ;;  %vm356_vm0 = vcmask 1040384   ;;  %v413_v18 = vunpack.c.h.b16 %v1406_v12 }
  0x40   :  { %584 = vmatpush.bf16.msra.mxu0 %v1421_v30  ;;  %610 = vmatpush.bf16.msra.mxu2 %v1423_v31  ;;  %v1431_v42 = vor.u32 %v1071_v32, %v1001_v38  ;;  %v1433_v47 = vor.u32 %v1072_v39, %v999_v35  ;;  %v927_v48 = vld [vmem:[#allocation2] sm:$0xf]  ;;  %v1053_v49 = vld [vmem:[#allocation2 + $0x4] sm:$0xf]  ;;  %v347_v4 = vcvt.s32.f32 %v343_v52  ;;  %vm358_vm1 = vcmask 1042434  }
  0x41   :  { %v1054_v53 = vld [vmem:[#allocation2 + $0x4] sm:$0xf0]  ;;  %v929_v54 = vld [vmem:[#allocation2 + $0x8] sm:$0xf0]  ;;  %v348_v9 = vcvt.s32.f32 %v344_v55  ;;  %v353_v14 = vrot.slane %v346_v63, 7  ;;  %vm368_vm2 = vcmask 7168   ;;  %v415_v32 = vpack.c.b16 %v413_v18, %v413_v18 }
  0x42   :  { %623 = vmatpush.bf16.msra.mxu3 %v1431_v42  ;;  %597 = vmatpush.bf16.msra.mxu1 %v1433_v47  ;;  %v1437_v7 = vor.u32 %v1054_v53, %v927_v48  ;;  %v1439_v3 = vor.u32 %v1053_v49, %v929_v54  ;;  %v354_v15 = vrot.slane %v347_v4, 6  ;;  %vm360_vm3 = vcmask 1041408   ;;  %369 = vst.msk [vmem:[#allocation5] sm:$0xff] %vm368_vm2, %v1184_v13 }
  0x43   :  { %v355_v1 = vrot.slane %v348_v9, 5  ;;  %v357_v20 = vsel %vm356_vm0, %v345_v62, %v353_v14  ;;  %vm365_vm4 = vcmp.lt.s32.totalorder %v47_v0, 512  ;;  %370 = vst.msk [vmem:[#allocation6] sm:$0xff] %vm368_vm2, %v1184_v13 }
  0x44   :  { %585 = vmatpush.bf16.msra.mxu0 %v1437_v7  ;;  %611 = vmatpush.bf16.msra.mxu2 %v1439_v3  ;;  %v1069_v21 = vld [vmem:[#allocation2 + $0x84] sm:$0xf]  ;;  %v991_v22 = vld [vmem:[#allocation2 + $0x80] sm:$0xf]  ;;  %371 = vst.msk [vmem:[#allocation7] sm:$0xff] %vm368_vm2, %v1184_v13 }
  0x45   :  { %v993_v27 = vld [vmem:[#allocation2 + $0x88] sm:$0xf0]  ;;  %v1070_v28 = vld [vmem:[#allocation2 + $0x84] sm:$0xf0]  ;;  %v359_v12 = vsel %vm358_vm1, %v354_v15, %v355_v1 }
  0x46   :  { %v996_v29 = vor.u32 %v1069_v21, %v993_v27  ;;  %v632_v13 = vld [vmem:[#allocation11 + $0x8] sm:$0xff] }
  0x47   :  { %586 = vmatmul.bf16.vlgmr.msra.gmra.mxu0 %v414_v8  ;;  %612 = vmatmul.bf16.vlgmr.msra.gmra.mxu2 %v414_v8 }
  0x48   :  { %671 = vmatpush.bf16.msrb.mxu2 %v1275_v51  ;;  %645 = vmatpush.bf16.msrb.mxu0 %v1273_v50  ;;  %v992_v51 = vor.u32 %v1070_v28, %v991_v22  ;;  %v361_v50 = vsel %vm360_vm3, %v357_v20, %v359_v12 }
  0x49   :  { %367 = vst.msk [vmem:[#allocation3] sm:$0xf] %vm365_vm4, %v361_v50  ;;  %624 = vmatpush.bf16.msra.mxu3 %v996_v29  ;;  %v404_v0 = vld [vmem:[#allocation5] sm:$0xff] }
  0x4a   :  { %598 = vmatpush.bf16.msra.mxu1 %v992_v51  ;;  %408 = vperm.xlu0 %1092, %v404_v0   ;;  %v824_v28 = vld [vmem:[#allocation6] sm:$0xff] }
  0x4c   :  { %672 = vmatpush.bf16.msrb.mxu2 %v1292_v6  ;;  %646 = vmatpush.bf16.msrb.mxu0 %v1290_v5  ;;  %v640_v5 = vunpack.c.h.b16 %v632_v13 }
  0x4d   :  { %684 = vmatpush.bf16.msrb.mxu3 %v1280_v58  ;;  %599 = vmatmul.bf16.vlgmr.msra.gmra.mxu1 %v415_v32  ;;  %v639_v58 = vunpack.c.l.b16 %v632_v13 }
  0x4e   :  { %658 = vmatpush.bf16.msrb.mxu1 %v1282_v59  ;;  %625 = vmatmul.bf16.vlgmr.msra.gmra.mxu3 %v415_v32  ;;  %v642_v6 = vpack.c.b16 %v640_v5, %v640_v5 }
  0x4f   :  { %v641_v59 = vpack.c.b16 %v639_v58, %v639_v58 }
  0x50   :  { %673 = vmatpush.bf16.msrb.mxu2 %v1312_v26  ;;  %647 = vmatpush.bf16.msrb.mxu0 %v1310_v25  ;;  %v1483_v26 = vld [vmem:[#allocation3] sm:$0xf] }
  0x51   :  { %685 = vmatpush.bf16.msrb.mxu3 %v1300_v16  ;;  %v1186_v16 = vmov 127   ;;  %v732_v58 = vperm.slane %v1483_v26, 3 }
  0x52   :  { %659 = vmatpush.bf16.msrb.mxu1 %v1302_v17  ;;  %1093 = vset.pattern.permute.xlu0 %v1186_v16 }
  0x54   :  { %674 = vmatpush.bf16.msrb.mxu2 %v1330_v44  ;;  %648 = vmatpush.bf16.msrb.mxu0 %v1328_v43 }
  0x55   :  { %686 = vmatpush.bf16.msrb.mxu3 %v1320_v33 }
  0x56   :  { %660 = vmatpush.bf16.msrb.mxu1 %v1322_v34  ;;  %v729_v34 = vperm.slane %v1483_v26, 0 }
  0x58   :  { %675 = vmatpush.bf16.msrb.mxu2 %v1368_v24  ;;  %649 = vmatpush.bf16.msrb.mxu0 %v1366_v23 }
  0x59   :  { %687 = vmatpush.bf16.msrb.mxu3 %v1344_v60 }
  0x5a   :  { %661 = vmatpush.bf16.msrb.mxu1 %v1346_v61 }
  0x5c   :  { %676 = vmatpush.bf16.msrb.mxu2 %v1395_v57  ;;  %650 = vmatpush.bf16.msrb.mxu0 %v1393_v56  ;;  %v730_v56 = vperm.slane %v1483_v26, 1 }
  0x5d   :  { %688 = vmatpush.bf16.msrb.mxu3 %v1385_v45 }
  0x5e   :  { %662 = vmatpush.bf16.msrb.mxu1 %v1387_v46 }
  0x60   :  { %677 = vmatpush.bf16.msrb.mxu2 %v1423_v31  ;;  %651 = vmatpush.bf16.msrb.mxu0 %v1421_v30 }
  0x61   :  { %689 = vmatpush.bf16.msrb.mxu3 %v1401_v10 }
  0x62   :  { %663 = vmatpush.bf16.msrb.mxu1 %v1403_v11 }
  0x64   :  { %678 = vmatpush.bf16.msrb.mxu2 %v1439_v3  ;;  %652 = vmatpush.bf16.msrb.mxu0 %v1437_v7 }
  0x65   :  { %690 = vmatpush.bf16.msrb.mxu3 %v1431_v42 }
  0x66   :  { %664 = vmatpush.bf16.msrb.mxu1 %v1433_v47 }
  0x67   :  { %679 = vmatmul.bf16.vlgmr.msrb.gmra.mxu2 %v641_v59  ;;  %653 = vmatmul.bf16.vlgmr.msrb.gmra.mxu0 %v641_v59 }
  0x69   :  { %691 = vmatpush.bf16.msrb.mxu3 %v996_v29 }
  0x6a   :  { %665 = vmatpush.bf16.msrb.mxu1 %v992_v51 }
  0x6c   :  { %692 = vmatmul.bf16.vlgmr.msrb.gmra.mxu3 %v642_v6 }
  0x6d   :  { %666 = vmatmul.bf16.vlgmr.msrb.gmra.mxu1 %v642_v6  ;;  %v731_v6 = vperm.slane %v1483_v26, 2 }
  0xb0   :  { %v1486_v61 = vpop.permute.xlu1 %721 }
  0xbc   :  { %v409_v17 = vpop.permute.xlu0 %408 }
  0xc4   :  { %v587_v25 = vpop.f32.mrf.mxu0 }
  0xc5   :  { %v588_v33 = vadd.f32 %v587_v25, %v409_v17 }
  0xca   :  { %v600_v43 = vpop.f32.mrf.mxu1  ;;  %v613_v44 = vpop.f32.mrf.mxu2 }
  0xcb   :  { %v601_v60 = vadd.f32 %v600_v43, %v588_v33  ;;  %v614_v45 = vadd.f32 %v613_v44, %v409_v17 }
  0xcc   :  { %v589_v23 = vpop.f32.mrf.mxu0 }
  0xcd   :  { %v737_v24 = vsub.f32 %v729_v34, %v601_v60  ;;  %v724_v53 = vsub.f32 %v1486_v61, %v601_v60 }
  0xcf   :  { %v741_v46 = vadd.f32 %v737_v24, %v1486_v61 }
  0xd1   :  { %v626_v57 = vpop.f32.mrf.mxu3  ;;  %1096 = vrcp.f32 %v741_v46  ;;  %v756_v40 = vand.u32 2147483648, %v741_v46  ;;  %vm750_vm5 = vweird.f32 %v741_v46  ;;  %v754_v42 = vand.u32 2147483647, %v741_v46 }
  0xd2   :  { %v627_v10 = vadd.f32 %v626_v57, %v614_v45  ;;  %v615_v11 = vpop.f32.mrf.mxu2  ;;  %v602_v30 = vpop.f32.mrf.mxu1 }
  0xd3   :  { %v757_v52 = vor.u32 1.1754944e-38, %v756_v40  ;;  %vm755_vm8 = vcmp.eq.f32.partialorder %v754_v42, 8.507059e+37 }
  0xd4   :  { %v738_v31 = vsub.f32 %v730_v56, %v627_v10  ;;  %635 = vperm.xlu0 %1093, %v627_v10   ;;  %v725_v18 = vsub.f32 %v1486_v61, %v627_v10 }
  0xd6   :  { %v742_v35 = vadd.f32 %v738_v31, %v1486_v61 }
  0xd7   :  { %v1097_v36 = vpop.eup %1096 }
  0xd8   :  { %1098 = vrcp.f32 %v742_v35  ;;  %v746_v38 = vmul.f32 %v1097_v36, %v741_v46  ;;  %vm751_vm6 = vweird.f32 %v1097_v36  ;;  %v771_v63 = vand.u32 2147483648, %v742_v35 }
  0xd9   :  { %v628_v37 = vpop.f32.mrf.mxu3  ;;  %vm752_vm7 = vmor %vm750_vm5, %vm751_vm6  ;;  %v769_v4 = vand.u32 2147483647, %v742_v35  ;;  %vm765_vm10 = vweird.f32 %v742_v35  ;;  %vm830_vm6 = vcmp.eq.f32.partialorder %v1483_v26, 1.0 }
  0xda   :  { %v747_v39 = vsub.f32 1.0, %v746_v38  ;;  %v772_v14 = vor.u32 1.1754944e-38, %v771_v63  ;;  %v831_v63 = vsel %vm830_vm6, 1, %v1185_v19 }
  0xdb   :  { %vm770_vm12 = vcmp.eq.f32.partialorder %v769_v4, 8.507059e+37  ;;  %v833_v4 = vperm.slane %v831_v63, 1  ;;  %v834_v26 = vperm.slane %v831_v63, 2 }
  0xdc   :  { %1095 = vset.pattern.permute.xlu0 %v1185_v19  ;;  %v748_v41 = vmul.f32 %v1097_v36, %v747_v39 }
  0xde   :  { %v1099_v47 = vpop.eup %1098  ;;  %v749_v48 = vadd.f32 %v1097_v36, %v748_v41 }
  0xdf   :  { %v761_v49 = vmul.f32 %v1099_v47, %v742_v35  ;;  %vm766_vm9 = vweird.f32 %v1099_v47 }
  0xe0   :  { %v753_v54 = vsel %vm752_vm7, %v1097_v36, %v749_v48  ;;  %vm767_vm11 = vmor %vm765_vm10, %vm766_vm9  ;;  %vm837_vm9 = vcmp.eq.s32.totalorder %v833_v4, 1  ;;  %vm838_vm10 = vcmp.eq.s32.totalorder %v834_v26, 1 }
  0xe1   :  { %v762_v55 = vsub.f32 1.0, %v761_v49  ;;  %v758_v62 = vsel %vm755_vm8, %v757_v52, %v753_v54  ;;  %vm819_vm8 = vcmp.lt.s32.totalorder %v1219_v2, 1 }
  0xe2   :  { %v1493_v7 = vmul.f32 %v758_v62, %v724_v53 }
  0xe3   :  { %v763_v3 = vmul.f32 %v1099_v47, %v762_v55 }
  0xe4   :  { %v805_v8 = vsub.f32 1.0, %v1493_v7  ;;  %v654_v15 = vpop.f32.mrf.mxu0 }
  0xe5   :  { %v764_v9 = vadd.f32 %v1099_v47, %v763_v3  ;;  %v832_v3 = vperm.slane %v831_v63, 0 }
  0xe6   :  { %809 = vrot.lane.b32.xlu1 %v805_v8, %s1187_s0 }
  0xe7   :  { %v768_v1 = vsel %vm767_vm11, %v1099_v47, %v764_v9  ;;  %vm836_vm7 = vcmp.eq.s32.totalorder %v832_v3, 1 }
  0xe8   :  { %v773_v20 = vsel %vm770_vm12, %v772_v14, %v768_v1  ;;  %v835_v1 = vperm.slane %v831_v63, 3 }
  0xe9   :  { %v1500_v21 = vmul.f32 %v773_v20, %v725_v18 }
  0xea   :  { %v680_v22 = vpop.f32.mrf.mxu2  ;;  %v667_v32 = vpop.f32.mrf.mxu1  ;;  %vm839_vm11 = vcmp.eq.s32.totalorder %v835_v1, 1 }
  0xeb   :  { %v806_v27 = vsub.f32 1.0, %v1500_v21 }
  0xec   :  { %v656_v29 = vpop.f32.mrf.mxu0 }
  0xed   :  { %811 = vrot.lane.b32.xlu2 %v806_v27, %s1187_s0  ;;  %v706_v29 = vld [vmem:[#allocation8 + $0x8] sm:$0xff] }
  0xee   :  { %827 = vperm.xlu1 %1094, %v824_v28  }
  0xef   :  { %v693_v12 = vpop.f32.mrf.mxu3 }
  0xf2   :  { %v682_v51 = vpop.f32.mrf.mxu2  ;;  %v669_v0 = vpop.f32.mrf.mxu1 }
  0xf7   :  { %v695_v50 = vpop.f32.mrf.mxu3 }
 0x146   :  { %v636_v13 = vpop.permute.xlu0 %635 }
 0x147   :  { %v655_v59 = vadd.f32 %v654_v15, %v636_v13  ;;  %v681_v5 = vadd.f32 %v680_v22, %v636_v13  ;;  %v812_v62 = vpop.permute.xlu2 %811  ;;  %v705_v22 = vld [vmem:[#allocation8] sm:$0xff] }
 0x149   :  { %v694_v16 = vadd.f32 %v693_v12, %v681_v5  ;;  %v668_v17 = vadd.f32 %v667_v32, %v655_v59  ;;  %v708_v5 = vld [vmem:[#allocation8 + $0x18] sm:$0xff] }
 0x14b   :  { %v740_v25 = vsub.f32 %v732_v58, %v694_v16  ;;  %v739_v33 = vsub.f32 %v731_v6, %v668_v17  ;;  %v727_v31 = vsub.f32 %v1486_v61, %v694_v16  ;;  %v726_v52 = vsub.f32 %v1486_v61, %v668_v17  ;;  %v707_v58 = vld [vmem:[#allocation8 + $0x10] sm:$0xff] }
 0x14d   :  { %v744_v34 = vadd.f32 %v740_v25, %v1486_v61  ;;  %v743_v43 = vadd.f32 %v739_v33, %v1486_v61  ;;  %v848_v33 = vld [vmem:[#allocation7] sm:$0xff] }
 0x14f   :  { %1100 = vrcp.f32 %v744_v34  ;;  %v801_v46 = vand.u32 2147483648, %v744_v34  ;;  %v799_v10 = vand.u32 2147483647, %v744_v34  ;;  %vm795_vm14 = vweird.f32 %v744_v34 }
 0x150   :  { %1102 = vrcp.f32 %v743_v43  ;;  %v786_v37 = vand.u32 2147483648, %v743_v43  ;;  %vm780_vm3 = vweird.f32 %v743_v43  ;;  %v784_v39 = vand.u32 2147483647, %v743_v43 }
 0x151   :  { %v802_v35 = vor.u32 1.1754944e-38, %v801_v46  ;;  %vm800_vm1 = vcmp.eq.f32.partialorder %v799_v10, 8.507059e+37 }
 0x152   :  { %v787_v47 = vor.u32 1.1754944e-38, %v786_v37  ;;  %vm785_vm5 = vcmp.eq.f32.partialorder %v784_v39, 8.507059e+37 }
 0x155   :  { %v1101_v44 = vpop.eup %1100 }
 0x156   :  { %v1103_v60 = vpop.eup %1102  ;;  %v791_v23 = vmul.f32 %v1101_v44, %v744_v34  ;;  %vm796_vm13 = vweird.f32 %v1101_v44 }
 0x157   :  { %v776_v24 = vmul.f32 %v1103_v60, %v743_v43  ;;  %vm781_vm15 = vweird.f32 %v1103_v60  ;;  %vm797_vm0 = vmor %vm795_vm14, %vm796_vm13 }
 0x158   :  { %v792_v45 = vsub.f32 1.0, %v791_v23  ;;  %vm782_vm4 = vmor %vm780_vm3, %vm781_vm15  ;;  %v810_v55 = vpop.permute.xlu1 %809 }
 0x159   :  { %v777_v56 = vsub.f32 1.0, %v776_v24  ;;  %v822_v18 = vsel %vm819_vm8, %v810_v55, %v812_v62 }
 0x15a   :  { %v793_v57 = vmul.f32 %v1101_v44, %v792_v45 }
 0x15b   :  { %v778_v11 = vmul.f32 %v1103_v60, %v777_v56 }
 0x15c   :  { %v794_v30 = vadd.f32 %v1101_v44, %v793_v57 }
 0x15d   :  { %v779_v36 = vadd.f32 %v1103_v60, %v778_v11 }
 0x15e   :  { %v798_v38 = vsel %vm797_vm0, %v1101_v44, %v794_v30 }
 0x15f   :  { %v803_v40 = vsel %vm800_vm1, %v802_v35, %v798_v38  ;;  %v783_v42 = vsel %vm782_vm4, %v1103_v60, %v779_v36 }
 0x160   :  { %v804_v41 = vmul.f32 %v803_v40, %v727_v31  ;;  %v788_v49 = vsel %vm785_vm5, %v787_v47, %v783_v42  ;;  %v828_v9 = vpop.permute.xlu1 %827 }
 0x161   :  { %v789_v53 = vmul.f32 %v788_v49, %v726_v52  ;;  %v841_v20 = vsel %vm837_vm9, %v828_v9, %v822_v18 }
 0x162   :  { %v808_v48 = vsub.f32 1.0, %v804_v41  ;;  %v845_v28 = vsub.f32 %v806_v27, %v841_v20 }
 0x163   :  { %v807_v54 = vsub.f32 1.0, %v789_v53 }
 0x164   :  { %815 = vrot.lane.b32.xlu2 %v808_v48, %s1187_s0  ;;  %v850_v59 = vmul.f32 %v845_v28, %v706_v29 }
 0x16c   :  { %813 = vrot.lane.b32.xlu2 %v807_v54, %s1187_s0 }
 0x174   :  { %700 = vrot.lane.b32.xlu2 %v694_v16, %s1187_s0 }
 0x1be   :  { %v816_v61 = vpop.permute.xlu2 %815 }
 0x1bf   :  { %v823_v14 = vsel %vm819_vm8, %v816_v61, %v810_v55 }
 0x1c0   :  { %v840_v15 = vsel %vm836_vm7, %v828_v9, %v823_v14 }
 0x1c1   :  { %v844_v19 = vsub.f32 %v805_v8, %v840_v15 }
 0x1c3   :  { %v849_v51 = vmul.f32 %v844_v19, %v705_v22 }
 0x1c5   :  { %v853_v27 = vadd.f32 %v850_v59, %v849_v51 }
 0x1c6   :  { %v814_v12 = vpop.permute.xlu2 %813 }
 0x1c7   :  { %v820_v50 = vsel %vm819_vm8, %v814_v12, %v816_v61  ;;  %v821_v32 = vsel %vm819_vm8, %v812_v62, %v814_v12 }
 0x1c8   :  { %v842_v0 = vsel %vm838_vm10, %v828_v9, %v821_v32  ;;  %v843_v13 = vsel %vm839_vm11, %v828_v9, %v820_v50 }
 0x1c9   :  { %v846_v7 = vsub.f32 %v807_v54, %v842_v0  ;;  %v847_v8 = vsub.f32 %v808_v48, %v843_v13 }
 0x1cb   :  { %v851_v21 = vmul.f32 %v846_v7, %v707_v58  ;;  %v852_v6 = vmul.f32 %v847_v8, %v708_v5 }
 0x1cd   :  { %v854_v16 = vadd.f32 %v853_v27, %v851_v21 }
 0x1ce   :  { %v701_v17 = vpop.permute.xlu2 %700 }
 0x1cf   :  { %704 = vst.msk [vmem:[#allocation5] sm:$0xff] %vm368_vm2, %v701_v17  ;;  %v855_v25 = vadd.f32 %v854_v16, %v852_v6 }
 0x1d1   :  { %856 = vadd.xlane.f32.xlu0 %v855_v25 }
 0x244   :  { %v857_v34 = vpop.xlane.xlu0 %856 }
 0x245   :  { %v858_v2 = vadd.f32 %v857_v34, %v848_v33 }
 0x247   :  { %859 = vst.msk [vmem:[#allocation7] sm:$0xff] %vm368_vm2, %v858_v2 }
 0x24e   :  { %v868_v43 = vld [vmem:[#allocation7] sm:$0xff] }
 0x24f   :  { %871 = vperm.xlu1 %1094, %v868_v43  }
 0x257   :  { %861 = vrot.lane.b32.xlu1 %v808_v48, %s1187_s0 }
 0x2c1   :  { %v872_v44 = vpop.permute.xlu1 %871 }
 0x2c2   :  { %874 = vst [vmem:[#allocation13] sm:$0xff] %v872_v44 }
 0x2c3   :  { %885 = dma.vmem_to_hbm [thread:$0]  %s881_s23, 128, %s883_s26, [#allocation10]  }
 0x2c9   :  { %v862_v60 = vpop.permute.xlu1 %861 }
 0x2ca   :  { %864 = vst.msk [vmem:[#allocation6] sm:$0xff] %vm368_vm2, %v862_v60 }
 0x2cb   :  { %1180 = dma.done.wait [#allocation10], 128  }
 0x2cc   :  { %1181 = vsyncadd [#allocation10], 4294967168 }
 0x2cd   :  { %890 = vsyncpa [#allocation9], 1 }
 0x2ce   :  { %891 = vsyncpa [#allocation12], 1 }
 0x2cf   :  { %892 = vsyncpa [#allocation10], 1 }

</bundles_post_ra>
